<compile_context>
chip_gen: v7x
topology: tpu7x:2x2x1
jax: 0.10.0
libtpu: 0.0.40
codegen_flags: <defaults>
</compile_context>

<pallas_src>
import functools

import jax
import jax.numpy as jnp
from jax.experimental import pallas as pl
from jax.experimental.pallas import tpu as pltpu


def _round_up(a, b):
    return (a + b - 1) // b * b


def _triplet_n2o_kernel(x_ref, yt_ref, tcol_ref, trow_ref, yaux_ref,
                        loss_ref, acc_ref, acc_fb_ref, *,
                        margin, norm_feat, hard_mining, n_valid, tm):
    i = pl.program_id(0)

    @pl.when(i == 0)
    def _init():
        acc_ref[...] = jnp.zeros_like(acc_ref)
        acc_fb_ref[...] = jnp.zeros_like(acc_fb_ref)

    x_bf = x_ref[...]                                   # (TM, Dp) bf16
    xf = x_bf.astype(jnp.float32)
    n_cols = yt_ref.shape[1]

    # ---- (TM, Ncol) distance slice -----------------------------------------
    if norm_feat:
        # cosine_dist: 2 - 2 * <x/||x||, y/||y||>.  yaux holds 1/max(||y||,eps)
        # per column, so we scale AFTER the bf16 matmul (no per-tile renorm of y).
        inv_xn = jax.lax.rsqrt(
            jnp.maximum(jnp.sum(xf * xf, axis=1, keepdims=True), 1e-24))
        xn = (xf * inv_xn).astype(jnp.bfloat16)
        sim = jnp.dot(xn, yt_ref[...], preferred_element_type=jnp.float32)
        dist = 2.0 - 2.0 * sim * yaux_ref[...]
    else:
        # euclidean_dist: sqrt(clamp(||x||^2 + ||y||^2 - 2 x.yT, 1e-12))
        xx = jnp.sum(xf * xf, axis=1, keepdims=True)    # (TM, 1)
        xy = jnp.dot(x_bf, yt_ref[...], preferred_element_type=jnp.float32)
        dist = jnp.sqrt(jnp.maximum(xx + yaux_ref[...] - 2.0 * xy, 1e-12))

    # ---- positive / negative masks (int32 compare, padded cols excluded) ----
    same = tcol_ref[...] == trow_ref[...]               # (TM, Ncol) bool
    col_valid = jax.lax.broadcasted_iota(jnp.int32, (tm, n_cols), 1) < n_valid
    is_pos = jnp.where(same & col_valid, 1.0, 0.0).astype(jnp.float32)
    is_neg = jnp.where((~same) & col_valid, 1.0, 0.0).astype(jnp.float32)

    # ---- example mining ------------------------------------------------------
    if hard_mining:
        dist_ap = jnp.max(dist * is_pos, axis=1, keepdims=True)
        # (1 - is_neg) == is_pos on real columns; also pushes padded columns
        # (is_pos == is_neg == 0) out of the min.
        dist_an = jnp.min(dist * is_neg + (1.0 - is_neg) * 1e9,
                          axis=1, keepdims=True)
    else:
        d_ap = dist * is_pos
        d_an = dist * is_neg
        # softmax_weights(d_ap, is_pos): W = exp(d_ap - max)*mask / (sum + 1e-6)
        max_ap = jnp.max(d_ap, axis=1, keepdims=True)
        w_ap = jnp.exp(d_ap - max_ap) * is_pos
        dist_ap = jnp.sum(d_ap * w_ap, axis=1, keepdims=True) * pl.reciprocal(
            jnp.sum(w_ap, axis=1, keepdims=True) + 1e-6, approx=True)
        # softmax_weights(-d_an, is_neg)
        max_an = jnp.max(-d_an, axis=1, keepdims=True)
        w_an = jnp.exp(-d_an - max_an) * is_neg
        dist_an = jnp.sum(d_an * w_an, axis=1, keepdims=True) * pl.reciprocal(
            jnp.sum(w_an, axis=1, keepdims=True) + 1e-6, approx=True)

    # ---- per-row loss term, masked for padded rows, accumulated -------------
    row_valid = (jax.lax.broadcasted_iota(jnp.int32, (tm, 1), 0) + i * tm) < n_valid

    if margin > 0:
        per = jnp.maximum(dist_ap - dist_an + margin, 0.0)
        acc_ref[...] += jnp.sum(jnp.where(row_valid, per, 0.0),
                                axis=0, keepdims=True)
    else:
        delta = dist_ap - dist_an
        per_sm = jnp.where(row_valid, jnp.log1p(jnp.exp(delta)), 0.0)
        per_fb = jnp.where(row_valid, jnp.maximum(delta + 0.3, 0.0), 0.0)
        acc_ref[...] += jnp.sum(per_sm, axis=0, keepdims=True)
        acc_fb_ref[...] += jnp.sum(per_fb, axis=0, keepdims=True)

    @pl.when(i == pl.num_programs(0) - 1)
    def _finalize():
        inv_n = jnp.float32(1.0 / n_valid)
        if margin > 0:
            loss_ref[...] = acc_ref[...] * inv_n
        else:
            sm = acc_ref[...] * inv_n
            fb = acc_fb_ref[...] * inv_n
            # reference: fall back to margin-ranking(0.3) if soft-margin is Inf
            loss_ref[...] = jnp.where(jnp.isinf(sm), fb, sm)


def triplet_loss_n2o(embedding_new, embedding_old, targets, margin,
                     norm_feat=False, hard_mining=True):
    """Pallas TPU implementation of triplet_loss_n2o.forward (scalar loss)."""
    N, D = embedding_new.shape
    margin = float(margin)
    norm_feat = bool(norm_feat)
    hard_mining = bool(hard_mining)

    # ---- padding / tiling ----------------------------------------------------
    d_pad = _round_up(max(D, 1), 128)          # lane-dense MXU contraction dim
    n_col = _round_up(max(N, 1), 128)          # lane-dense dist-slice columns
    n_row_min = _round_up(max(N, 1), 8)

    # Pick the largest row tile that keeps everything under a VMEM budget that
    # is safe on all generations (v7x has only 64 MiB physical VMEM).
    budget = 40 * 1024 * 1024
    tm = 8
    for cand in (1024, 512, 256, 128, 64, 32, 16, 8):
        t = min(cand, n_row_min)
        need = (n_col * d_pad * 2              # resident old-emb (bf16, transposed)
                + 2 * t * d_pad * 2            # double-buffered new-emb tile
                + 10 * t * n_col * 4           # dist slice + mask/weight temporaries
                + (1 << 20))                   # targets / aux rows / accumulators
        if need <= budget:
            tm = t
            break
    n_row = _round_up(N, tm)
    grid = (n_row // tm,)

    # ---- wrapper-side layout plumbing (bf16 cast, pad, transpose, aux rows) --
    x32 = jnp.asarray(embedding_new, jnp.float32)
    y32 = jnp.asarray(embedding_old, jnp.float32)
    x_bf = jnp.pad(x32.astype(jnp.bfloat16), ((0, n_row - N), (0, d_pad - D)))
    y_bf = jnp.pad(y32.astype(jnp.bfloat16), ((0, n_col - N), (0, d_pad - D)))
    y_t = y_bf.T                               # (d_pad, n_col): MXU-ready RHS

    tgt = jnp.asarray(targets).astype(jnp.int32).reshape(-1)
    t_col = jnp.pad(tgt.reshape(N, 1), ((0, n_row - N), (0, 0)))
    t_row = jnp.pad(tgt.reshape(1, N), ((0, 0), (0, n_col - N)))

    ysq_row = jnp.sum(y_bf.astype(jnp.float32) ** 2, axis=1).reshape(1, n_col)
    if norm_feat:
        y_aux = jax.lax.rsqrt(jnp.maximum(ysq_row, 1e-24))   # 1/max(||y||,1e-12)
    else:
        y_aux = ysq_row                                      # ||y||^2 per column

    kernel = functools.partial(
        _triplet_n2o_kernel,
        margin=margin, norm_feat=norm_feat, hard_mining=hard_mining,
        n_valid=N, tm=tm)

    out = pl.pallas_call(
        kernel,
        out_shape=jax.ShapeDtypeStruct((1, 1), jnp.float32),
        grid=grid,
        in_specs=[
            pl.BlockSpec((tm, d_pad), lambda i: (i, 0)),      # new-emb row tile
            pl.BlockSpec((d_pad, n_col), lambda i: (0, 0)),   # old-emb^T, resident
            pl.BlockSpec((tm, 1), lambda i: (i, 0)),          # targets column tile
            pl.BlockSpec((1, n_col), lambda i: (0, 0)),       # targets row, resident
            pl.BlockSpec((1, n_col), lambda i: (0, 0)),       # ||y||^2 or 1/||y|| row
        ],
        out_specs=pl.BlockSpec((1, 1), lambda i: (0, 0)),     # resident scalar out
        scratch_shapes=[
            pltpu.VMEM((1, 1), jnp.float32),                  # running loss sum
            pltpu.VMEM((1, 1), jnp.float32),                  # soft-margin fallback sum
        ],
        compiler_params=pltpu.CompilerParams(
            dimension_semantics=("arbitrary",),               # reduction into scalar
            vmem_limit_bytes=48 * 1024 * 1024,                # <= v7x physical VMEM
        ),
    )(x_bf, y_t, t_col, t_row, y_aux)
    return out[0, 0]


def _ref_loss(x, y, t, margin, norm_feat, hard_mining):
    """Pure-JAX f32 reference mirroring the PyTorch module."""
    x = x.astype(jnp.float32)
    y = y.astype(jnp.float32)
    if norm_feat:
        xn = x / jnp.maximum(jnp.linalg.norm(x, axis=1, keepdims=True), 1e-12)
        yn = y / jnp.maximum(jnp.linalg.norm(y, axis=1, keepdims=True), 1e-12)
        dist = 2.0 - 2.0 * xn @ yn.T
    else:
        xx = jnp.sum(x * x, axis=1, keepdims=True)
        yy = jnp.sum(y * y, axis=1, keepdims=True)
        dist = jnp.sqrt(jnp.maximum(xx + yy.T - 2.0 * x @ y.T, 1e-12))
    n = x.shape[0]
    tc = t.reshape(n, 1)
    is_pos = (tc == tc.T).astype(jnp.float32)
    is_neg = 1.0 - is_pos
    if hard_mining:
        ap = jnp.max(dist * is_pos, axis=1)
        an = jnp.min(dist * is_neg + is_pos * 1e9, axis=1)
    else:
        d_ap = dist * is_pos
        d_an = dist * is_neg
        w_ap = jnp.exp(d_ap - jnp.max(d_ap, axis=1, keepdims=True)) * is_pos
        w_ap = w_ap / (jnp.sum(w_ap, axis=1, keepdims=True) + 1e-6)
        w_an = jnp.exp(-d_an - jnp.max(-d_an, axis=1, keepdims=True)) * is_neg
        w_an = w_an / (jnp.sum(w_an, axis=1, keepdims=True) + 1e-6)
        ap = jnp.sum(d_ap * w_ap, axis=1)
        an = jnp.sum(d_an * w_an, axis=1)
    if margin > 0:
        return jnp.mean(jnp.maximum(ap - an + margin, 0.0))
    l_sm = jnp.mean(jnp.log1p(jnp.exp(ap - an)))
    l_fb = jnp.mean(jnp.maximum(ap - an + 0.3, 0.0))
    return jnp.where(jnp.isinf(l_sm), l_fb, l_sm)


if __name__ == "__main__":
    key = jax.random.PRNGKey(0)
    k1, k2 = jax.random.split(key)

    # small shapes: N=8 samples (4 identities x 2), D=32 feature dims
    N, D = 8, 32
    embedding_new = jax.random.normal(k1, (N, D), dtype=jnp.float32)
    embedding_old = jax.random.normal(k2, (N, D), dtype=jnp.float32)
    targets = jnp.array([0, 0, 1, 1, 2, 2, 3, 3], dtype=jnp.int32)

    # cosine distance + hard mining + margin-ranking loss (margin > 0)
    loss1 = triplet_loss_n2o(embedding_new, embedding_old, targets,
                             margin=0.3, norm_feat=True, hard_mining=True)
    jax.block_until_ready(loss1)
    ref1 = _ref_loss(embedding_new, embedding_old, targets, 0.3, True, True)

    # euclidean / weighted-mining / soft-margin path (margin == 0)
    loss2 = triplet_loss_n2o(embedding_new, embedding_old, targets,
                             margin=0.0, norm_feat=False, hard_mining=False)
    jax.block_until_ready(loss2)
    ref2 = _ref_loss(embedding_new, embedding_old, targets, 0.0, False, False)

    # loose tolerance: kernel uses bf16 MXU operands + approx reciprocal
    assert abs(float(loss1) - float(ref1)) <= 0.08 + 0.08 * abs(float(ref1)), \
        (float(loss1), float(ref1))
    assert abs(float(loss2) - float(ref2)) <= 0.08 + 0.08 * abs(float(ref2)), \
        (float(loss2), float(ref2))

    print("KERNEL_OK")
</pallas_src>

<mosaic_0001>
module attributes {stable_mosaic.version = 11 : i64} {
  func.func @_triplet_n2o_kernel(%arg0: i32, %arg1: memref<8x128xbf16, #tpu.memory_space<vmem>>, %arg2: memref<128x128xbf16, #tpu.memory_space<vmem>>, %arg3: memref<8x1xi32, #tpu.memory_space<vmem>>, %arg4: memref<1x128xi32, #tpu.memory_space<vmem>>, %arg5: memref<1x128xf32, #tpu.memory_space<vmem>>, %arg6: memref<1x1xf32, #tpu.memory_space<vmem>>, %arg7: memref<1x1xf32, #tpu.memory_space<vmem>>, %arg8: memref<1x1xf32, #tpu.memory_space<vmem>>) attributes {dimension_semantics = [#tpu.dimension_semantics<arbitrary>], iteration_bounds = array<i64: 1>, scalar_prefetch = 0 : i64, scratch_operands = 2 : i64, tpu.core_type = #tpu.core_type<tc>, window_params = [{transform_indices = @transform_0, window_bounds = array<i64: 8, 128>}, {pipeline_mode = #tpu.pipeline_mode<synchronous>, transform_indices = @transform_1, window_bounds = array<i64: 128, 128>}, {transform_indices = @transform_2, window_bounds = array<i64: 8, 1>}, {pipeline_mode = #tpu.pipeline_mode<synchronous>, transform_indices = @transform_3, window_bounds = array<i64: 1, 128>}, {pipeline_mode = #tpu.pipeline_mode<synchronous>, transform_indices = @transform_4, window_bounds = array<i64: 1, 128>}, {pipeline_mode = #tpu.pipeline_mode<synchronous>, transform_indices = @transform_5, window_bounds = array<i64: 1, 1>}]} {
    %c0_i32 = arith.constant 0 : i32
    %0 = arith.cmpi eq, %arg0, %c0_i32 : i32
    %1 = arith.extui %0 : i1 to i32
    %c0_i32_0 = arith.constant 0 : i32
    %2 = arith.cmpi ne, %1, %c0_i32_0 : i32
    scf.if %2 {
      %cst_35 = arith.constant 0.000000e+00 : f32
      %72 = vector.broadcast %cst_35 : f32 to vector<1x1xf32>
      %c0_36 = arith.constant 0 : index
      %c0_37 = arith.constant 0 : index
      %73 = vector.load %arg7[%c0_36, %c0_37] : memref<1x1xf32, #tpu.memory_space<vmem>>, vector<1x1xf32>
      tpu.vector_store %arg7[%c0_36, %c0_37], %72 {strides = array<i32>} : memref<1x1xf32, #tpu.memory_space<vmem>>, vector<1x1xf32>,
      %cst_38 = arith.constant 0.000000e+00 : f32
      %74 = vector.broadcast %cst_38 : f32 to vector<1x1xf32>
      %c0_39 = arith.constant 0 : index
      %c0_40 = arith.constant 0 : index
      %75 = vector.load %arg8[%c0_39, %c0_40] : memref<1x1xf32, #tpu.memory_space<vmem>>, vector<1x1xf32>
      tpu.vector_store %arg8[%c0_39, %c0_40], %74 {strides = array<i32>} : memref<1x1xf32, #tpu.memory_space<vmem>>, vector<1x1xf32>,
    } else {
    }
    %c0 = arith.constant 0 : index
    %c0_1 = arith.constant 0 : index
    %3 = vector.load %arg1[%c0, %c0_1] : memref<8x128xbf16, #tpu.memory_space<vmem>>, vector<8x128xbf16>
    %4 = arith.extf %3 : vector<8x128xbf16> to vector<8x128xf32>
    %5 = arith.mulf %4, %4 : vector<8x128xf32>
    %cst = arith.constant dense<0.000000e+00> : vector<8xf32>
    %6 = vector.multi_reduction <add>, %5, %cst [1] : vector<8x128xf32> to vector<8xf32>
    %7 = vector.shape_cast %6 : vector<8xf32> to vector<8x1xf32>
    %cst_2 = arith.constant 1.000000e-24 : f32
    %8 = vector.broadcast %cst_2 : f32 to vector<8x1xf32>
    %9 = arith.maximumf %7, %8 : vector<8x1xf32>
    %10 = math.rsqrt %9 : vector<8x1xf32>
    %11 = vector.broadcast %10 : vector<8x1xf32> to vector<8x128xf32>
    %12 = arith.mulf %4, %11 : vector<8x128xf32>
    %13 = arith.truncf %12 : vector<8x128xf32> to vector<8x128xbf16>
    %c0_3 = arith.constant 0 : index
    %c0_4 = arith.constant 0 : index
    %14 = vector.load %arg2[%c0_3, %c0_4] : memref<128x128xbf16, #tpu.memory_space<vmem>>, vector<128x128xbf16>
    %cst_5 = arith.constant dense<0.000000e+00> : vector<8x128xf32>
    %15 = tpu.matmul %13, %14, %cst_5 {dimension_numbers = #tpu.dot_dimension_numbers<[1], [0], [0], [1], [0, 0, 1, 1], [], []>} : vector<8x128xbf16>, vector<128x128xbf16>, vector<8x128xf32> -> vector<8x128xf32>
    %cst_6 = arith.constant 2.000000e+00 : f32
    %16 = vector.broadcast %cst_6 : f32 to vector<8x128xf32>
    %17 = arith.mulf %16, %15 : vector<8x128xf32>
    %c0_7 = arith.constant 0 : index
    %c0_8 = arith.constant 0 : index
    %18 = vector.load %arg5[%c0_7, %c0_8] : memref<1x128xf32, #tpu.memory_space<vmem>>, vector<1x128xf32>
    %19 = vector.broadcast %18 : vector<1x128xf32> to vector<8x128xf32>
    %20 = arith.mulf %17, %19 : vector<8x128xf32>
    %cst_9 = arith.constant 2.000000e+00 : f32
    %21 = vector.broadcast %cst_9 : f32 to vector<8x128xf32>
    %22 = arith.subf %21, %20 : vector<8x128xf32>
    %c0_10 = arith.constant 0 : index
    %c0_11 = arith.constant 0 : index
    %23 = vector.load %arg3[%c0_10, %c0_11] : memref<8x1xi32, #tpu.memory_space<vmem>>, vector<8x1xi32>
    %c0_12 = arith.constant 0 : index
    %c0_13 = arith.constant 0 : index
    %24 = vector.load %arg4[%c0_12, %c0_13] : memref<1x128xi32, #tpu.memory_space<vmem>>, vector<1x128xi32>
    %25 = vector.broadcast %23 : vector<8x1xi32> to vector<8x128xi32>
    %26 = vector.broadcast %24 : vector<1x128xi32> to vector<8x128xi32>
    %27 = arith.cmpi eq, %25, %26 : vector<8x128xi32>
    %28 = tpu.iota {dimensions = array<i32: 1>} : vector<8x128xi32>
    %c8_i32 = arith.constant 8 : i32
    %29 = vector.broadcast %c8_i32 : i32 to vector<8x128xi32>
    %30 = arith.cmpi slt, %28, %29 : vector<8x128xi32>
    %31 = arith.andi %27, %30 : vector<8x128xi1>
    %cst_14 = arith.constant 1.000000e+00 : f32
    %cst_15 = arith.constant 0.000000e+00 : f32
    %32 = vector.broadcast %cst_14 : f32 to vector<8x128xf32>
    %33 = vector.broadcast %cst_15 : f32 to vector<8x128xf32>
    %34 = arith.select %31, %32, %33 : vector<8x128xi1>, vector<8x128xf32>
    %cst_16 = arith.constant dense<true> : vector<8x128xi1>
    %35 = arith.xori %27, %cst_16 : vector<8x128xi1>
    %36 = arith.andi %35, %30 : vector<8x128xi1>
    %cst_17 = arith.constant 1.000000e+00 : f32
    %cst_18 = arith.constant 0.000000e+00 : f32
    %37 = vector.broadcast %cst_17 : f32 to vector<8x128xf32>
    %38 = vector.broadcast %cst_18 : f32 to vector<8x128xf32>
    %39 = arith.select %36, %37, %38 : vector<8x128xi1>, vector<8x128xf32>
    %40 = arith.mulf %22, %34 : vector<8x128xf32>
    %cst_19 = arith.constant dense<0xFF800000> : vector<8xf32>
    %41 = vector.multi_reduction <maximumf>, %40, %cst_19 [1] : vector<8x128xf32> to vector<8xf32>
    %42 = vector.shape_cast %41 : vector<8xf32> to vector<8x1xf32>
    %43 = arith.mulf %22, %39 : vector<8x128xf32>
    %cst_20 = arith.constant 1.000000e+00 : f32
    %44 = vector.broadcast %cst_20 : f32 to vector<8x128xf32>
    %45 = arith.subf %44, %39 : vector<8x128xf32>
    %cst_21 = arith.constant 1.000000e+09 : f32
    %46 = vector.broadcast %cst_21 : f32 to vector<8x128xf32>
    %47 = arith.mulf %45, %46 : vector<8x128xf32>
    %48 = arith.addf %43, %47 : vector<8x128xf32>
    %cst_22 = arith.constant dense<0x7F800000> : vector<8xf32>
    %49 = vector.multi_reduction <minimumf>, %48, %cst_22 [1] : vector<8x128xf32> to vector<8xf32>
    %50 = vector.shape_cast %49 : vector<8xf32> to vector<8x1xf32>
    %51 = tpu.iota {dimensions = array<i32: 0>} : vector<8x1xi32>
    %c8_i32_23 = arith.constant 8 : i32
    %52 = arith.muli %arg0, %c8_i32_23 : i32
    %53 = vector.broadcast %52 : i32 to vector<8x1xi32>
    %54 = arith.addi %51, %53 : vector<8x1xi32>
    %c8_i32_24 = arith.constant 8 : i32
    %55 = vector.broadcast %c8_i32_24 : i32 to vector<8x1xi32>
    %56 = arith.cmpi slt, %54, %55 : vector<8x1xi32>
    %57 = arith.subf %42, %50 : vector<8x1xf32>
    %cst_25 = arith.constant 3.000000e-01 : f32
    %58 = vector.broadcast %cst_25 : f32 to vector<8x1xf32>
    %59 = arith.addf %57, %58 : vector<8x1xf32>
    %cst_26 = arith.constant 0.000000e+00 : f32
    %60 = vector.broadcast %cst_26 : f32 to vector<8x1xf32>
    %61 = arith.maximumf %59, %60 : vector<8x1xf32>
    %c0_27 = arith.constant 0 : index
    %c0_28 = arith.constant 0 : index
    %62 = vector.load %arg7[%c0_27, %c0_28] : memref<1x1xf32, #tpu.memory_space<vmem>>, vector<1x1xf32>
    %cst_29 = arith.constant 0.000000e+00 : f32
    %63 = vector.broadcast %cst_29 : f32 to vector<8x1xf32>
    %64 = arith.select %56, %61, %63 : vector<8x1xi1>, vector<8x1xf32>
    %cst_30 = arith.constant dense<0.000000e+00> : vector<1xf32>
    %65 = vector.multi_reduction <add>, %64, %cst_30 [0] : vector<8x1xf32> to vector<1xf32>
    %66 = vector.shape_cast %65 : vector<1xf32> to vector<1x1xf32>
    %67 = arith.addf %62, %66 : vector<1x1xf32>
    %c0_31 = arith.constant 0 : index
    %c0_32 = arith.constant 0 : index
    %68 = vector.load %arg7[%c0_31, %c0_32] : memref<1x1xf32, #tpu.memory_space<vmem>>, vector<1x1xf32>
    tpu.vector_store %arg7[%c0_31, %c0_32], %67 {strides = array<i32>} : memref<1x1xf32, #tpu.memory_space<vmem>>, vector<1x1xf32>,
    %c0_i32_33 = arith.constant 0 : i32
    %69 = arith.cmpi eq, %arg0, %c0_i32_33 : i32
    %70 = arith.extui %69 : i1 to i32
    %c0_i32_34 = arith.constant 0 : i32
    %71 = arith.cmpi ne, %70, %c0_i32_34 : i32
    scf.if %71 {
      %c0_35 = arith.constant 0 : index
      %c0_36 = arith.constant 0 : index
      %72 = vector.load %arg7[%c0_35, %c0_36] : memref<1x1xf32, #tpu.memory_space<vmem>>, vector<1x1xf32>
      %cst_37 = arith.constant 1.250000e-01 : f32
      %73 = vector.broadcast %cst_37 : f32 to vector<1x1xf32>
      %74 = arith.mulf %72, %73 : vector<1x1xf32>
      %c0_38 = arith.constant 0 : index
      %c0_39 = arith.constant 0 : index
      %75 = vector.load %arg6[%c0_38, %c0_39] : memref<1x1xf32, #tpu.memory_space<vmem>>, vector<1x1xf32>
      tpu.vector_store %arg6[%c0_38, %c0_39], %74 {strides = array<i32>} : memref<1x1xf32, #tpu.memory_space<vmem>>, vector<1x1xf32>,
    } else {
    }
    return
  }
  func.func @transform_0(%arg0: i32) -> (i32, i32) {
    %c0_i32 = arith.constant 0 : i32
    %c0_i32_0 = arith.constant 0 : i32
    return %arg0, %c0_i32 : i32, i32
  }
  func.func @transform_1(%arg0: i32) -> (i32, i32) {
    %c0_i32 = arith.constant 0 : i32
    %c0_i32_0 = arith.constant 0 : i32
    %c0_i32_1 = arith.constant 0 : i32
    return %c0_i32, %c0_i32_0 : i32, i32
  }
  func.func @transform_2(%arg0: i32) -> (i32, i32) {
    %c0_i32 = arith.constant 0 : i32
    %c0_i32_0 = arith.constant 0 : i32
    return %arg0, %c0_i32 : i32, i32
  }
  func.func @transform_3(%arg0: i32) -> (i32, i32) {
    %c0_i32 = arith.constant 0 : i32
    %c0_i32_0 = arith.constant 0 : i32
    %c0_i32_1 = arith.constant 0 : i32
    return %c0_i32, %c0_i32_0 : i32, i32
  }
  func.func @transform_4(%arg0: i32) -> (i32, i32) {
    %c0_i32 = arith.constant 0 : i32
    %c0_i32_0 = arith.constant 0 : i32
    %c0_i32_1 = arith.constant 0 : i32
    return %c0_i32, %c0_i32_0 : i32, i32
  }
  func.func @transform_5(%arg0: i32) -> (i32, i32) {
    %c0_i32 = arith.constant 0 : i32
    %c0_i32_0 = arith.constant 0 : i32
    %c0_i32_1 = arith.constant 0 : i32
    return %c0_i32, %c0_i32_0 : i32, i32
  }
}

</mosaic_0001>

<bundles_post_ra>
// kernel: tpu_custom_call.1
= control target key start
LH: loop header
LB: loop body
LE: loop exit
PB: predicated region body
PF: predicated region fallthrough
CT: control target
= control target key end

     0   :  { %10 = vsyncpa [#allocation5], 0  ;;  %s429_s0 = inlined_call_operand.vmem [shape: bf16[8,128], index: 0, kind: input, shape index: {}]   ;;  %s430_s1 = inlined_call_operand.hbm [shape: bf16[128,128], index: 1, kind: input, shape index: {}]   ;;  %s431_s2 = inlined_call_operand.vmem [shape: s32[8,1], index: 2, kind: input, shape index: {}]   ;;  %s432_s3 = inlined_call_operand.vmem [shape: s32[1,128], index: 3, kind: input, shape index: {}]   ;;  %s433_s4 = inlined_call_operand.vmem [shape: f32[1,128], index: 4, kind: input, shape index: {}]   ;;  %s434_s5 = inlined_call_operand.hbm [shape: f32[1,1], index: 5, kind: output, shape index: {}]  }
   0x1   :  { %11 = vsyncpa [#allocation6], 0  ;;  %s340_s18 = smov [#allocation4]   ;;  %s292_s22 = scalar_lea.hbm %s430_s1, 1024 }
   0x2   :  { %s19_s19 = sshll.u32 %s340_s18, 4  ;;  %p293_p0 = scmp.ne.s32.totalorder %s430_s1, %s292_s22  ;;  %s20_s19 = int_to_ptr.vmem [resolvable:$true] %s19_s19 }
   0x3   :  { %p296_p1 = scmp.lt.u32.totalorder %s292_s22, %s430_s1 }
   0x5   :  { %p298_p2 = pnand %p296_p1, %p293_p0 }
   0x7   :  { %301 = shalt.err (!%p298_p2)
}
   0x8   :  { %s302_s27 = scalar_lea.vmem %s20_s19, 1024  ;;  %p307_p4 = scmp.lt.s32.totalorder %s20_s19, %s20_s19 }
   0x9   :  { %p303_p3 = scmp.ne.s32.totalorder %s20_s19, %s302_s27  ;;  %p308_p5 = scmp.lt.s32.totalorder %s302_s27, %s302_s27 }
   0xb   :  { %p309_p6 = por %p308_p5, %p307_p4 }
   0xd   :  { %p310_p7 = pnand %p309_p6, %p303_p3 }
   0xf   :  { %313 = shalt.err (!%p310_p7)
}
  0x10   :  { %s341_s28 = smov 64   ;;  %s342_s29 = smov 4  }
  0x11   :  { %25 = dma.hbm_to_vmem [thread:$0]  %s430_s1, 1024, %s20_s19, [#allocation5], %s341_s28, %s341_s28, %s342_s29  }
  0x12   :  { %336 = dma.done.wait [#allocation5], 1024  }
  0x13   :  { %337 = vsyncadd [#allocation5], 4294966272  ;;  %v343_v0 = vmov 0.0   ;;  %v43_v1 = vld [vmem:[%s429_s0] sm:$0xf]  ;;  %v283_v5 = vld [vmem:[#allocation4 + $0x8] sm:$0xff]   ;;  %v176_v19 = vlaneseq }
  0x14   :  { %253 = vmatprep.subr.bf16.mxu0 %v343_v0  ;;  %v44_v2 = vunpack.c.l.bf16 %v43_v1  ;;  %v282_v3 = vld [vmem:[#allocation4] sm:$0xff]   ;;  %v284_v6 = vld [vmem:[#allocation4 + $0x10] sm:$0xff]   ;;  %v285_v7 = vld [vmem:[#allocation4 + $0x18] sm:$0xff]   ;;  %vm344_vm0 = vmmov 0   ;;  %v345_v13 = vmov 0   ;;  %vm346_vm3 = vmmov 1  }
  0x15   :  { %254 = vmatpush3.bf16.msra.mxu0 %v282_v3  ;;  %v286_v8 = vld [vmem:[#allocation4 + $0x20] sm:$0xff]   ;;  %v287_v9 = vld [vmem:[#allocation4 + $0x28] sm:$0xff]   ;;  %269 = vmatprep.mubr.msk.bf16.mxu0 %vm344_vm0, %v343_v0  ;;  %v288_v10 = vld [vmem:[#allocation4 + $0x30] sm:$0xff]   ;;  %v177_v22 = vand.u32 127, %v176_v19  ;;  %vm40_vm7 = vcmask 0  }
  0x16   :  { %v45_v4 = vmul.f32 %v44_v2, %v44_v2  ;;  %255 = vmatprep.subr.bf16.mxu0 %v343_v0  ;;  %v289_v11 = vld [vmem:[#allocation4 + $0x38] sm:$0xff]   ;;  %281 = vset.pattern.permute.xlu0 %v345_v13  ;;  %41 = vst.msk [vmem:[#allocation2] sm:$0x1] %vm40_vm7, %v343_v0 }
  0x17   :  { %v166_v12 = vld [vmem:[%s431_s2] sm:$0xff]  ;;  %vm178_vm2 = vcmp.lt.s32.totalorder %v177_v22, 8 }
  0x18   :  { %46 = vadd.xlane.f32.xlu0 %v45_v4  ;;  %v243_v20 = vld [vmem:[%s432_s3] ss:$0 sm:$0xff]  ;;  %s347_s3 = smov [#allocation7]  }
  0x19   :  { %256 = vmatpush3.bf16.msra.mxu0 %v283_v5  ;;  %v242_v25 = vld [vmem:[%s433_s4] ss:$0 sm:$0xff]  ;;  %s225_s4 = sshll.u32 %s347_s3, 4  ;;  %s226_s4 = int_to_ptr.vmem [resolvable:$true] %s225_s4 }
  0x1a   :  { %257 = vmatprep.subr.bf16.mxu0 %v343_v0  ;;  %s314_s12 = scalar_lea.vmem %s226_s4, 16  ;;  %s318_s13 = scalar_lea.vmem %s226_s4, 32 }
  0x1b   :  { %p315_p8 = scmp.ne.s32.totalorder %s226_s4, %s314_s12  ;;  %p319_p9 = scmp.lt.s32.totalorder %s226_s4, %s226_s4 }
  0x1c   :  { %p320_p10 = scmp.lt.s32.totalorder %s318_s13, %s314_s12 }
  0x1d   :  { %258 = vmatpush3.bf16.msra.mxu0 %v284_v6  ;;  %v202_v48 = vld [vmem:[#allocation2] sm:$0x1] }
  0x1e   :  { %259 = vmatprep.subr.bf16.mxu0 %v343_v0  ;;  %p321_p11 = por %p320_p10, %p319_p9 }
  0x20   :  { %p322_p12 = pnand %p321_p11, %p315_p8 }
  0x21   :  { %260 = vmatpush3.bf16.msra.mxu0 %v285_v7 }
  0x22   :  { %261 = vmatprep.subr.bf16.mxu0 %v343_v0 }
  0x25   :  { %262 = vmatpush3.bf16.msra.mxu0 %v286_v8 }
  0x26   :  { %263 = vmatprep.subr.bf16.mxu0 %v343_v0 }
  0x29   :  { %264 = vmatpush3.bf16.msra.mxu0 %v287_v9 }
  0x2a   :  { %265 = vmatprep.subr.bf16.mxu0 %v343_v0 }
  0x2d   :  { %266 = vmatpush3.bf16.msra.mxu0 %v288_v10 }
  0x2e   :  { %267 = vmatprep.subr.bf16.mxu0 %v343_v0  ;;  %169 = vperm.xlu0 %281, %v166_v12  }
  0x31   :  { %268 = vmatpush3.bf16.msra.mxu0 %v289_v11 }
  0xa5   :  { %v47_v14 = vpop.xlane.xlu0 %46 }
  0xa6   :  { %v48_v15 = vmax.f32 %v47_v14, 1e-24 }
  0xa8   :  { %290 = vrsqrt.f32 %v48_v15 }
  0xad   :  { %v170_v21 = vpop.permute.xlu0 %169 }
  0xae   :  { %vm175_vm1 = vcmp.eq.s32.totalorder %v170_v21, %v243_v20 }
  0xaf   :  { %vm181_vm4 = vmxor %vm175_vm1, %vm346_vm3 }
  0xb0   :  { %vm182_vm5 = vmand %vm181_vm4, %vm178_vm2 }
  0xb1   :  { %v183_v24 = vsel %vm182_vm5, 1.0, %v343_v0  ;;  %vm179_vm6 = vmand %vm175_vm1, %vm178_vm2 }
  0xb2   :  { %v291_v16 = vpop.eup %290  ;;  %v188_v31 = vsub.f32 1.0, %v183_v24  ;;  %v180_v32 = vsel %vm179_vm6, 1.0, %v343_v0 }
  0xb3   :  { %v50_v17 = vmul.f32 %v291_v16, %v44_v2 }
  0xb4   :  { %v189_v36 = vmul.f32 1e+09, %v188_v31 }
  0xb5   :  { %v51_v18 = vpack.c.bf16 %v50_v17, %v50_v17 }
  0xb7   :  { %270 = vmatmul.mubr.bf16.vlgmr.msra.gmra.mrb[0].mxu0 %v51_v18 }
 0x18a   :  { %v150_v23 = vpop.f32.mrb[0].mxu0 }
 0x18b   :  { %v156_v26 = vmul.f32 2.0, %v150_v23  ;;  %v271_v27 = vpop.f32.mrb[1].mxu0 }
 0x18c   :  { %v153_v28 = vpop.f32.mrb[2].mxu0 }
 0x18d   :  { %v272_v29 = vpop.f32.mrb[3].mxu0  ;;  %v164_v30 = vmul.f32 %v242_v25, %v156_v26 }
 0x18f   :  { %v165_v33 = vsub.f32 2.0, %v164_v30 }
 0x191   :  { %v184_v34 = vmul.f32 %v180_v32, %v165_v33  ;;  %v187_v35 = vmul.f32 %v183_v24, %v165_v33 }
 0x193   :  { %185 = vmax.xlane.f32.xlu1 %v184_v34  ;;  %v190_v37 = vadd.f32 %v189_v36, %v187_v35 }
 0x197   :  { %191 = vmin.xlane.f32.xlu1 %v190_v37 }
 0x220   :  { %v186_v38 = vpop.xlane.xlu1 %185 }
 0x224   :  { %v192_v39 = vpop.xlane.xlu1 %191 }
 0x225   :  { %v199_v40 = vsub.f32 %v186_v38, %v192_v39 }
 0x227   :  { %v200_v41 = vadd.f32 0.3, %v199_v40 }
 0x229   :  { %v201_v42 = vmax.f32 %v200_v41, 0.0 }
 0x22b   :  { %v204_v43 = vrot.slane %v201_v42, 4 }
 0x22d   :  { %v205_v44 = vadd.f32 %v204_v43, %v201_v42 }
 0x22f   :  { %v206_v45 = vrot.slane %v205_v44, 2 }
 0x231   :  { %v207_v46 = vadd.f32 %v206_v45, %v205_v44 }
 0x233   :  { %v208_v47 = vrot.slane %v207_v46, 1 }
 0x235   :  { %v209_v49 = vadd.f32 %v208_v47, %v207_v46 }
 0x237   :  { %v210_v50 = vadd.f32 %v209_v49, %v202_v48 }
 0x239   :  { %212 = vst.msk [vmem:[#allocation2] sm:$0x1] %vm40_vm7, %v210_v50 }
 0x240   :  { %v216_v51 = vld [vmem:[#allocation2] sm:$0x1] }
 0x241   :  { %v217_v52 = vmul.f32 0.125, %v216_v51 }
 0x243   :  { %218 = vst.msk [vmem:[#allocation7] sm:$0x1] %vm40_vm7, %v217_v52 }
 0x244   :  { %325 = shalt.err (!%p322_p12)
}
 0x245   :  { %s326_s16 = scalar_lea.hbm %s434_s5, 16 }
 0x246   :  { %p327_p13 = scmp.ne.s32.totalorder %s434_s5, %s326_s16  ;;  %p330_p0 = scmp.lt.u32.totalorder %s326_s16, %s434_s5 }
 0x248   :  { %p332_p1 = pnand %p330_p0, %p327_p13 }
 0x24a   :  { %335 = shalt.err (!%p332_p1)
}
 0x24b   :  { %228 = dma.vmem_to_hbm [thread:$0]  %s226_s4, 16, %s434_s5, [#allocation6]  }
 0x24c   :  { %338 = dma.done.wait [#allocation6], 16  }
 0x24d   :  { %339 = vsyncadd [#allocation6], 4294967280 }
 0x24e   :  { %232 = vsyncpa [#allocation5], 1 }
 0x24f   :  { %233 = vsyncpa [#allocation6], 1 }

</bundles_post_ra>
